<compile_context>
chip_gen: v6e
topology: v6e:2x2x1
jax: 0.10.0
libtpu: 0.0.40
codegen_flags: <defaults>
</compile_context>

<pallas_src>
import functools

import jax
import jax.numpy as jnp
from jax.experimental import pallas as pl
from jax.experimental.pallas import tpu as pltpu

MAX_TILE_D = 8192     # feature elements (lanes) per grid step; multiple of 128
N_SLICES = 2          # leading "parallel" axis (both TCs on v7x; harmless elsewhere)
NORM_EPS = 1e-12      # torch.nn.functional.normalize eps
COS_EPS = 1e-8        # nn.CosineSimilarity eps (never binds after normalize)


def _round_up(x, m):
    return (x + m - 1) // m * m


def _cos_partials_kernel(a_ref, b_ref, dot_ref, na_ref, nb_ref,
                         acc_dot, acc_na, acc_nb,
                         *, d, tile_d, tiles_per_slice, n_tiles):
    """Accumulate per-row sum(a*b), sum(a*a), sum(b*b) for one feature slice."""
    s = pl.program_id(0)          # parallel slice of the feature axis
    t = pl.program_id(1)          # reduction over tiles inside the slice

    @pl.when(t == 0)
    def _():
        acc_dot[...] = jnp.zeros_like(acc_dot)
        acc_na[...] = jnp.zeros_like(acc_na)
        acc_nb[...] = jnp.zeros_like(acc_nb)

    a = a_ref[...].astype(jnp.float32)      # (B, tile_d), lane-dense
    b = b_ref[...].astype(jnp.float32)

    # Mask (a) the ragged tail of the feature axis and (b) duplicated clamped
    # tiles when n_tiles does not divide n_slices * tiles_per_slice.
    tile_id = s * tiles_per_slice + t
    col0 = jnp.minimum(tile_id, n_tiles - 1) * tile_d
    cols = col0 + jax.lax.broadcasted_iota(jnp.int32, a.shape, 1)
    mask = jnp.logical_and(cols < d, tile_id < n_tiles)

    am = jnp.where(mask, a, 0.0)            # NaN-safe: masked lanes become 0
    bm = jnp.where(mask, b, 0.0)

    acc_dot[...] += am * bm
    acc_na[...] += am * am
    acc_nb[...] += bm * bm

    @pl.when(t == tiles_per_slice - 1)
    def _():
        dot_ref[...] = jnp.sum(acc_dot[...], axis=-1, keepdims=True)[None]
        na_ref[...] = jnp.sum(acc_na[...], axis=-1, keepdims=True)[None]
        nb_ref[...] = jnp.sum(acc_nb[...], axis=-1, keepdims=True)[None]


def _pair_partial_sums(t1, t2):
    """Per-row (dot, |a|^2, |b|^2) over the flattened feature axis, one HBM pass."""
    B = t1.shape[0]
    a2 = t1.reshape(B, -1)     # contiguous flatten: metadata-only, no HBM copy
    b2 = t2.reshape(B, -1)
    D = a2.shape[1]

    tile_d = min(MAX_TILE_D, _round_up(D, 128))
    n_tiles = pl.cdiv(D, tile_d)
    n_slices = max(1, min(N_SLICES, n_tiles))
    tiles_per_slice = pl.cdiv(n_tiles, n_slices)

    kernel = functools.partial(
        _cos_partials_kernel, d=D, tile_d=tile_d,
        tiles_per_slice=tiles_per_slice, n_tiles=n_tiles)

    def in_map(s, t):
        # clamp so no block index is ever fully out of bounds; duplicated
        # tiles are zeroed by the in-kernel mask.
        return (0, jnp.minimum(s * tiles_per_slice + t, n_tiles - 1))

    out_sds = jax.ShapeDtypeStruct((n_slices, B, 1), jnp.float32)
    out_spec = pl.BlockSpec((1, B, 1), lambda s, t: (s, 0, 0))

    dot_p, na_p, nb_p = pl.pallas_call(
        kernel,
        out_shape=(out_sds, out_sds, out_sds),
        grid_spec=pltpu.PrefetchScalarGridSpec(
            num_scalar_prefetch=0,
            grid=(n_slices, tiles_per_slice),
            in_specs=[
                pl.BlockSpec((B, tile_d), in_map),
                pl.BlockSpec((B, tile_d), in_map),
            ],
            out_specs=(out_spec, out_spec, out_spec),
            scratch_shapes=[
                pltpu.VMEM((B, tile_d), jnp.float32),
                pltpu.VMEM((B, tile_d), jnp.float32),
                pltpu.VMEM((B, tile_d), jnp.float32),
            ],
        ),
        compiler_params=pltpu.CompilerParams(
            dimension_semantics=("parallel", "arbitrary")),
    )(a2, b2)

    dot = jnp.sum(dot_p, axis=0)[:, 0]      # combine parallel slices: (B,)
    na = jnp.sum(na_p, axis=0)[:, 0]
    nb = jnp.sum(nb_p, axis=0)[:, 0]
    return dot, na, nb


def calculate_cosine_loss(t1, t2, scale_factor):
    """scale_factor * (1 - mean_B cos(t1_flat, t2_flat)), like the module."""
    dot, na, nb = _pair_partial_sums(t1, t2)
    # F.normalize(x, p=2, dim=1): x / max(||x||, 1e-12). After that both rows
    # have unit norm, so the CosineSimilarity denominator max(||u||*||v||, 1e-8)
    # is 1 (and 0-rows give cos = 0 in both formulations), so:
    norm_a = jnp.maximum(jnp.sqrt(na), NORM_EPS)
    norm_b = jnp.maximum(jnp.sqrt(nb), NORM_EPS)
    cos = dot / (norm_a * norm_b)
    return scale_factor * (1.0 - jnp.mean(cos))


def feature_aligner_loss_cos(list1, list2, scale_factor):
    """FeatureAlignerLossCOS.forward: mean over pairs of the scaled cosine loss."""
    # Note: pairs with identical shapes could be fused into one pallas_call;
    # shapes differ across pyramid levels in general, so we keep one call/pair.
    losses = [calculate_cosine_loss(t1, t2, scale_factor)
              for t1, t2 in zip(list1, list2)]
    return jnp.mean(jnp.stack(losses))


def _ref_loss(list1, list2, scale_factor):
    """Pure-JAX reference mirroring the PyTorch module."""
    losses = []
    for t1, t2 in zip(list1, list2):
        B = t1.shape[0]
        a = t1.reshape(B, -1).astype(jnp.float32)
        b = t2.reshape(B, -1).astype(jnp.float32)
        an = a / jnp.maximum(jnp.linalg.norm(a, axis=1, keepdims=True), 1e-12)
        bn = b / jnp.maximum(jnp.linalg.norm(b, axis=1, keepdims=True), 1e-12)
        num = jnp.sum(an * bn, axis=1)
        den = jnp.maximum(jnp.linalg.norm(an, axis=1) * jnp.linalg.norm(bn, axis=1),
                          1e-8)
        cos = num / den
        losses.append(scale_factor * (1.0 - jnp.mean(cos)))
    return jnp.mean(jnp.stack(losses))


if __name__ == "__main__":
    key = jax.random.PRNGKey(0)
    keys = jax.random.split(key, 6)

    # Multi-scale feature maps (different shapes per list entry, as in an FPN):
    #   D = 1024  -> single tile
    #   D = 16384 -> two 8192-wide tiles (exercises the parallel slice axis)
    #   D = 300   -> ragged tail (exercises in-kernel masking, no padding)
    shapes = [(2, 4, 16, 16), (2, 64, 16, 16), (2, 3, 10, 10)]
    list1 = [jax.random.normal(keys[i], s, jnp.float32)
             for i, s in enumerate(shapes)]
    list2 = [jax.random.normal(keys[i + 3], s, jnp.float32)
             for i, s in enumerate(shapes)]
    scale_factor = 0.5

    out = feature_aligner_loss_cos(list1, list2, scale_factor)
    out = jax.block_until_ready(out)

    ref = _ref_loss(list1, list2, scale_factor)
    assert jnp.allclose(out, ref, rtol=1e-5, atol=1e-5), (out, ref)

    print("KERNEL_OK")
</pallas_src>

<mosaic_0001>
module attributes {stable_mosaic.version = 11 : i64} {
  func.func @_cos_partials_kernel(%arg0: i32, %arg1: i32, %arg2: memref<2x1024xf32, #tpu.memory_space<vmem>>, %arg3: memref<2x1024xf32, #tpu.memory_space<vmem>>, %arg4: memref<1x2x1xf32, #tpu.memory_space<vmem>>, %arg5: memref<1x2x1xf32, #tpu.memory_space<vmem>>, %arg6: memref<1x2x1xf32, #tpu.memory_space<vmem>>, %arg7: memref<2x1024xf32, #tpu.memory_space<vmem>>, %arg8: memref<2x1024xf32, #tpu.memory_space<vmem>>, %arg9: memref<2x1024xf32, #tpu.memory_space<vmem>>) attributes {dimension_semantics = [#tpu.dimension_semantics<parallel>, #tpu.dimension_semantics<arbitrary>], iteration_bounds = array<i64: 1, 1>, scalar_prefetch = 0 : i64, scratch_operands = 3 : i64, tpu.core_type = #tpu.core_type<tc>, window_params = [{transform_indices = @transform_0, window_bounds = array<i64: 2, 1024>}, {transform_indices = @transform_1, window_bounds = array<i64: 2, 1024>}, {transform_indices = @transform_2, window_bounds = array<i64: 1, 2, 1>}, {transform_indices = @transform_3, window_bounds = array<i64: 1, 2, 1>}, {transform_indices = @transform_4, window_bounds = array<i64: 1, 2, 1>}]} {
    %c0_i32 = arith.constant 0 : i32
    %0 = arith.cmpi eq, %arg1, %c0_i32 : i32
    %1 = arith.extui %0 : i1 to i32
    %c0_i32_0 = arith.constant 0 : i32
    %2 = arith.cmpi ne, %1, %c0_i32_0 : i32
    scf.if %2 {
      %cst_22 = arith.constant 0.000000e+00 : f32
      %36 = vector.broadcast %cst_22 : f32 to vector<2x1024xf32>
      %c0_23 = arith.constant 0 : index
      %c0_24 = arith.constant 0 : index
      %37 = vector.load %arg7[%c0_23, %c0_24] : memref<2x1024xf32, #tpu.memory_space<vmem>>, vector<2x1024xf32>
      tpu.vector_store %arg7[%c0_23, %c0_24], %36 {strides = array<i32>} : memref<2x1024xf32, #tpu.memory_space<vmem>>, vector<2x1024xf32>,
      %cst_25 = arith.constant 0.000000e+00 : f32
      %38 = vector.broadcast %cst_25 : f32 to vector<2x1024xf32>
      %c0_26 = arith.constant 0 : index
      %c0_27 = arith.constant 0 : index
      %39 = vector.load %arg8[%c0_26, %c0_27] : memref<2x1024xf32, #tpu.memory_space<vmem>>, vector<2x1024xf32>
      tpu.vector_store %arg8[%c0_26, %c0_27], %38 {strides = array<i32>} : memref<2x1024xf32, #tpu.memory_space<vmem>>, vector<2x1024xf32>,
      %cst_28 = arith.constant 0.000000e+00 : f32
      %40 = vector.broadcast %cst_28 : f32 to vector<2x1024xf32>
      %c0_29 = arith.constant 0 : index
      %c0_30 = arith.constant 0 : index
      %41 = vector.load %arg9[%c0_29, %c0_30] : memref<2x1024xf32, #tpu.memory_space<vmem>>, vector<2x1024xf32>
      tpu.vector_store %arg9[%c0_29, %c0_30], %40 {strides = array<i32>} : memref<2x1024xf32, #tpu.memory_space<vmem>>, vector<2x1024xf32>,
    } else {
    }
    %c0 = arith.constant 0 : index
    %c0_1 = arith.constant 0 : index
    %3 = vector.load %arg2[%c0, %c0_1] : memref<2x1024xf32, #tpu.memory_space<vmem>>, vector<2x1024xf32>
    %c0_2 = arith.constant 0 : index
    %c0_3 = arith.constant 0 : index
    %4 = vector.load %arg3[%c0_2, %c0_3] : memref<2x1024xf32, #tpu.memory_space<vmem>>, vector<2x1024xf32>
    %c1_i32 = arith.constant 1 : i32
    %5 = arith.muli %arg0, %c1_i32 : i32
    %6 = arith.addi %5, %arg1 : i32
    %c0_i32_4 = arith.constant 0 : i32
    %7 = arith.minsi %6, %c0_i32_4 : i32
    %c1024_i32 = arith.constant 1024 : i32
    %8 = arith.muli %7, %c1024_i32 : i32
    %9 = tpu.iota {dimensions = array<i32: 1>} : vector<2x1024xi32>
    %10 = vector.broadcast %8 : i32 to vector<2x1024xi32>
    %11 = arith.addi %10, %9 : vector<2x1024xi32>
    %c1024_i32_5 = arith.constant 1024 : i32
    %12 = vector.broadcast %c1024_i32_5 : i32 to vector<2x1024xi32>
    %13 = arith.cmpi slt, %11, %12 : vector<2x1024xi32>
    %c1_i32_6 = arith.constant 1 : i32
    %14 = arith.cmpi slt, %6, %c1_i32_6 : i32
    %15 = vector.broadcast %14 : i1 to vector<2x1024xi1>
    %16 = arith.andi %13, %15 : vector<2x1024xi1>
    %cst = arith.constant 0.000000e+00 : f32
    %17 = vector.broadcast %cst : f32 to vector<2x1024xf32>
    %18 = arith.select %16, %3, %17 : vector<2x1024xi1>, vector<2x1024xf32>
    %cst_7 = arith.constant 0.000000e+00 : f32
    %19 = vector.broadcast %cst_7 : f32 to vector<2x1024xf32>
    %20 = arith.select %16, %4, %19 : vector<2x1024xi1>, vector<2x1024xf32>
    %c0_8 = arith.constant 0 : index
    %c0_9 = arith.constant 0 : index
    %21 = vector.load %arg7[%c0_8, %c0_9] : memref<2x1024xf32, #tpu.memory_space<vmem>>, vector<2x1024xf32>
    %22 = arith.mulf %18, %20 : vector<2x1024xf32>
    %23 = arith.addf %21, %22 : vector<2x1024xf32>
    %c0_10 = arith.constant 0 : index
    %c0_11 = arith.constant 0 : index
    %24 = vector.load %arg7[%c0_10, %c0_11] : memref<2x1024xf32, #tpu.memory_space<vmem>>, vector<2x1024xf32>
    tpu.vector_store %arg7[%c0_10, %c0_11], %23 {strides = array<i32>} : memref<2x1024xf32, #tpu.memory_space<vmem>>, vector<2x1024xf32>,
    %c0_12 = arith.constant 0 : index
    %c0_13 = arith.constant 0 : index
    %25 = vector.load %arg8[%c0_12, %c0_13] : memref<2x1024xf32, #tpu.memory_space<vmem>>, vector<2x1024xf32>
    %26 = arith.mulf %18, %18 : vector<2x1024xf32>
    %27 = arith.addf %25, %26 : vector<2x1024xf32>
    %c0_14 = arith.constant 0 : index
    %c0_15 = arith.constant 0 : index
    %28 = vector.load %arg8[%c0_14, %c0_15] : memref<2x1024xf32, #tpu.memory_space<vmem>>, vector<2x1024xf32>
    tpu.vector_store %arg8[%c0_14, %c0_15], %27 {strides = array<i32>} : memref<2x1024xf32, #tpu.memory_space<vmem>>, vector<2x1024xf32>,
    %c0_16 = arith.constant 0 : index
    %c0_17 = arith.constant 0 : index
    %29 = vector.load %arg9[%c0_16, %c0_17] : memref<2x1024xf32, #tpu.memory_space<vmem>>, vector<2x1024xf32>
    %30 = arith.mulf %20, %20 : vector<2x1024xf32>
    %31 = arith.addf %29, %30 : vector<2x1024xf32>
    %c0_18 = arith.constant 0 : index
    %c0_19 = arith.constant 0 : index
    %32 = vector.load %arg9[%c0_18, %c0_19] : memref<2x1024xf32, #tpu.memory_space<vmem>>, vector<2x1024xf32>
    tpu.vector_store %arg9[%c0_18, %c0_19], %31 {strides = array<i32>} : memref<2x1024xf32, #tpu.memory_space<vmem>>, vector<2x1024xf32>,
    %c0_i32_20 = arith.constant 0 : i32
    %33 = arith.cmpi eq, %arg1, %c0_i32_20 : i32
    %34 = arith.extui %33 : i1 to i32
    %c0_i32_21 = arith.constant 0 : i32
    %35 = arith.cmpi ne, %34, %c0_i32_21 : i32
    scf.if %35 {
      %c0_22 = arith.constant 0 : index
      %c0_23 = arith.constant 0 : index
      %36 = vector.load %arg7[%c0_22, %c0_23] : memref<2x1024xf32, #tpu.memory_space<vmem>>, vector<2x1024xf32>
      %cst_24 = arith.constant dense<0.000000e+00> : vector<2xf32>
      %37 = vector.multi_reduction <add>, %36, %cst_24 [1] : vector<2x1024xf32> to vector<2xf32>
      %38 = vector.shape_cast %37 : vector<2xf32> to vector<2x1xf32>
      %39 = vector.shape_cast %38 : vector<2x1xf32> to vector<1x2x1xf32>
      %c0_25 = arith.constant 0 : index
      %c0_26 = arith.constant 0 : index
      %c0_27 = arith.constant 0 : index
      %40 = vector.load %arg4[%c0_25, %c0_26, %c0_27] : memref<1x2x1xf32, #tpu.memory_space<vmem>>, vector<1x2x1xf32>
      tpu.vector_store %arg4[%c0_25, %c0_26, %c0_27], %39 {strides = array<i32>} : memref<1x2x1xf32, #tpu.memory_space<vmem>>, vector<1x2x1xf32>,
      %c0_28 = arith.constant 0 : index
      %c0_29 = arith.constant 0 : index
      %41 = vector.load %arg8[%c0_28, %c0_29] : memref<2x1024xf32, #tpu.memory_space<vmem>>, vector<2x1024xf32>
      %cst_30 = arith.constant dense<0.000000e+00> : vector<2xf32>
      %42 = vector.multi_reduction <add>, %41, %cst_30 [1] : vector<2x1024xf32> to vector<2xf32>
      %43 = vector.shape_cast %42 : vector<2xf32> to vector<2x1xf32>
      %44 = vector.shape_cast %43 : vector<2x1xf32> to vector<1x2x1xf32>
      %c0_31 = arith.constant 0 : index
      %c0_32 = arith.constant 0 : index
      %c0_33 = arith.constant 0 : index
      %45 = vector.load %arg5[%c0_31, %c0_32, %c0_33] : memref<1x2x1xf32, #tpu.memory_space<vmem>>, vector<1x2x1xf32>
      tpu.vector_store %arg5[%c0_31, %c0_32, %c0_33], %44 {strides = array<i32>} : memref<1x2x1xf32, #tpu.memory_space<vmem>>, vector<1x2x1xf32>,
      %c0_34 = arith.constant 0 : index
      %c0_35 = arith.constant 0 : index
      %46 = vector.load %arg9[%c0_34, %c0_35] : memref<2x1024xf32, #tpu.memory_space<vmem>>, vector<2x1024xf32>
      %cst_36 = arith.constant dense<0.000000e+00> : vector<2xf32>
      %47 = vector.multi_reduction <add>, %46, %cst_36 [1] : vector<2x1024xf32> to vector<2xf32>
      %48 = vector.shape_cast %47 : vector<2xf32> to vector<2x1xf32>
      %49 = vector.shape_cast %48 : vector<2x1xf32> to vector<1x2x1xf32>
      %c0_37 = arith.constant 0 : index
      %c0_38 = arith.constant 0 : index
      %c0_39 = arith.constant 0 : index
      %50 = vector.load %arg6[%c0_37, %c0_38, %c0_39] : memref<1x2x1xf32, #tpu.memory_space<vmem>>, vector<1x2x1xf32>
      tpu.vector_store %arg6[%c0_37, %c0_38, %c0_39], %49 {strides = array<i32>} : memref<1x2x1xf32, #tpu.memory_space<vmem>>, vector<1x2x1xf32>,
    } else {
    }
    return
  }
  func.func @transform_0(%arg0: i32, %arg1: i32) -> (i32, i32) {
    %c1_i32 = arith.constant 1 : i32
    %0 = arith.muli %arg0, %c1_i32 : i32
    %1 = arith.addi %0, %arg1 : i32
    %c0_i32 = arith.constant 0 : i32
    %2 = arith.minsi %1, %c0_i32 : i32
    %c0_i32_0 = arith.constant 0 : i32
    %c0_i32_1 = arith.constant 0 : i32
    return %c0_i32_0, %2 : i32, i32
  }
  func.func @transform_1(%arg0: i32, %arg1: i32) -> (i32, i32) {
    %c1_i32 = arith.constant 1 : i32
    %0 = arith.muli %arg0, %c1_i32 : i32
    %1 = arith.addi %0, %arg1 : i32
    %c0_i32 = arith.constant 0 : i32
    %2 = arith.minsi %1, %c0_i32 : i32
    %c0_i32_0 = arith.constant 0 : i32
    %c0_i32_1 = arith.constant 0 : i32
    return %c0_i32_0, %2 : i32, i32
  }
  func.func @transform_2(%arg0: i32, %arg1: i32) -> (i32, i32, i32) {
    %c0_i32 = arith.constant 0 : i32
    %c0_i32_0 = arith.constant 0 : i32
    %c0_i32_1 = arith.constant 0 : i32
    return %arg0, %c0_i32, %c0_i32_0 : i32, i32, i32
  }
  func.func @transform_3(%arg0: i32, %arg1: i32) -> (i32, i32, i32) {
    %c0_i32 = arith.constant 0 : i32
    %c0_i32_0 = arith.constant 0 : i32
    %c0_i32_1 = arith.constant 0 : i32
    return %arg0, %c0_i32, %c0_i32_0 : i32, i32, i32
  }
  func.func @transform_4(%arg0: i32, %arg1: i32) -> (i32, i32, i32) {
    %c0_i32 = arith.constant 0 : i32
    %c0_i32_0 = arith.constant 0 : i32
    %c0_i32_1 = arith.constant 0 : i32
    return %arg0, %c0_i32, %c0_i32_0 : i32, i32, i32
  }
}

</mosaic_0001>

<bundles_post_ra>
// kernel: tpu_custom_call.1
= control target key start
LH: loop header
LB: loop body
LE: loop exit
PB: predicated region body
PF: predicated region fallthrough
CT: control target
= control target key end

     0   :  { %10 = vsyncpa [#allocation6], 0  ;;  %s808_s0 = inlined_call_operand.hbm [shape: f32[2,1024], index: 0, kind: input, shape index: {}]   ;;  %s809_s1 = inlined_call_operand.hbm [shape: f32[2,1024], index: 1, kind: input, shape index: {}]   ;;  %s810_s2 = inlined_call_operand.vmem [shape: f32[1,2,1], index: 2, kind: output, shape index: {0}]   ;;  %s811_s3 = inlined_call_operand.vmem [shape: f32[1,2,1], index: 3, kind: output, shape index: {1}]   ;;  %s812_s4 = inlined_call_operand.vmem [shape: f32[1,2,1], index: 4, kind: output, shape index: {2}]  }
   0x1   :  { %11 = vsyncpa [#allocation8], 0  ;;  %s664_s15 = smov [#allocation5]   ;;  %s665_s17 = smov [#allocation7]  }
   0x2   :  { %s24_s16 = sshll.u32 %s664_s15, 4  ;;  %s40_s18 = sshll.u32 %s665_s17, 4  ;;  %s25_s16 = int_to_ptr.vmem [resolvable:$true] %s24_s16  ;;  %s41_s18 = int_to_ptr.vmem [resolvable:$true] %s40_s18 }
   0x3   :  { %s628_s19 = scalar_lea.vmem %s25_s16, 256  ;;  %p633_p1 = scmp.lt.s32.totalorder %s25_s16, %s25_s16 }
   0x4   :  { %p629_p0 = scmp.ne.s32.totalorder %s25_s16, %s628_s19  ;;  %p634_p2 = scmp.lt.s32.totalorder %s628_s19, %s628_s19 }
   0x6   :  { %p635_p3 = por %p634_p2, %p633_p1 }
   0x8   :  { %p636_p4 = pnand %p635_p3, %p629_p0 }
   0xa   :  { %639 = shalt.err (!%p636_p4)
}
   0xb   :  { %27 = dma.hbm_to_vmem [thread:$0]  %s808_s0, 256, %s25_s16, [#allocation6]  }
   0xc   :  { %s648_s22 = scalar_lea.vmem %s41_s18, 256  ;;  %p653_p6 = scmp.lt.s32.totalorder %s41_s18, %s41_s18 }
   0xd   :  { %p649_p5 = scmp.ne.s32.totalorder %s41_s18, %s648_s22  ;;  %p654_p7 = scmp.lt.s32.totalorder %s648_s22, %s648_s22 }
   0xf   :  { %p655_p8 = por %p654_p7, %p653_p6 }
  0x11   :  { %p656_p9 = pnand %p655_p8, %p649_p5 }
  0x13   :  { %659 = shalt.err (!%p656_p9)
}
  0x14   :  { %43 = dma.hbm_to_vmem [thread:$0]  %s809_s1, 256, %s41_s18, [#allocation8]  }
  0x15   :  { %660 = dma.done.wait [#allocation6], 256  }
  0x16   :  { %661 = vsyncadd [#allocation6], 4294967040 }
  0x17   :  { %662 = dma.done.wait [#allocation8], 256  }
  0x18   :  { %663 = vsyncadd [#allocation8], 4294967040  ;;  %v120_v0 = vlaneseq  ;;  %v666_v1 = vmov 1983009808   ;;  %v68_v6 = vld [vmem:[#allocation5] sm:$0xff]  ;;  %v69_v7 = vld [vmem:[#allocation5 + $0x8] sm:$0xff] }
  0x19   :  { %v118_v2 = vunpack.c.l.s4 %v666_v1  ;;  %v70_v8 = vld [vmem:[#allocation7] sm:$0xff]  ;;  %v71_v9 = vld [vmem:[#allocation7 + $0x8] sm:$0xff]  ;;  %v116_v10 = vcombine.high %v68_v6, %v68_v6  ;;  %v133_v12 = vcombine.high %v69_v7, %v69_v7  ;;  %vm441_vm0 = vcmask 1041408  }
  0x1a   :  { %v121_v3 = vshrl.u32 %v120_v0, 7  ;;  %v168_v14 = vcombine.high %v70_v8, %v70_v8  ;;  %v185_v16 = vcombine.high %v71_v9, %v71_v9  ;;  %vm459_vm1 = vcmask 1024  }
  0x1b   :  { %v119_v4 = vunpack.c.0.s8 %v118_v2 }
  0x1d   :  { %v698_v5 = vsub.s32 %v119_v4, %v121_v3 }
  0x1f   :  { %v701_v11 = vrot.slane %v68_v6, %v698_v5  ;;  %v704_v13 = vrot.slane %v69_v7, %v698_v5  ;;  %v175_v15 = vrot.slane %v70_v8, %v698_v5  ;;  %v192_v17 = vrot.slane %v71_v9, %v698_v5 }
  0x20   :  { %v709_v18 = vrot.slane %v116_v10, %v698_v5  ;;  %v714_v20 = vrot.slane %v133_v12, %v698_v5  ;;  %v182_v22 = vrot.slane %v168_v14, %v698_v5  ;;  %v199_v24 = vrot.slane %v185_v16, %v698_v5 }
  0x21   :  { %v131_v19 = vcombine.high %v701_v11, %v701_v11  ;;  %v718_v21 = vcombine.high %v704_v13, %v704_v13  ;;  %v183_v23 = vcombine.high %v175_v15, %v175_v15  ;;  %v200_v25 = vcombine.high %v192_v17, %v192_v17 }
  0x22   :  { %v724_v26 = vcombine.high %v709_v18, %v709_v18  ;;  %v728_v27 = vcombine.high %v714_v20, %v714_v20  ;;  %v220_v28 = vmul.f32 %v175_v15, %v701_v11  ;;  %v224_v29 = vmul.f32 %v192_v17, %v704_v13 }
  0x23   :  { %v184_v30 = vcombine.high %v182_v22, %v182_v22  ;;  %v201_v31 = vcombine.high %v199_v24, %v199_v24  ;;  %v221_v32 = vmul.f32 %v183_v23, %v131_v19  ;;  %v222_v33 = vmul.f32 %v182_v22, %v709_v18 }
  0x24   :  { %v225_v34 = vmul.f32 %v200_v25, %v718_v21  ;;  %v226_v35 = vmul.f32 %v199_v24, %v714_v20  ;;  %v336_v36 = vmul.f32 %v175_v15, %v175_v15  ;;  %v337_v37 = vmul.f32 %v183_v23, %v183_v23 }
  0x25   :  { %v223_v38 = vmul.f32 %v184_v30, %v724_v26  ;;  %v227_v39 = vmul.f32 %v201_v31, %v728_v27  ;;  %v236_v40 = vcombine.low %v220_v28, %v221_v32  ;;  %v338_v41 = vmul.f32 %v182_v22, %v182_v22 }
  0x26   :  { %v253_v42 = vcombine.low %v224_v29, %v225_v34  ;;  %v339_v43 = vmul.f32 %v184_v30, %v184_v30  ;;  %v340_v44 = vmul.f32 %v192_v17, %v192_v17  ;;  %v341_v45 = vmul.f32 %v200_v25, %v200_v25 }
  0x27   :  { %v237_v46 = vcombine.low %v222_v33, %v223_v38  ;;  %v244_v47 = vrot.slane %v236_v40, %v698_v5  ;;  %v254_v48 = vcombine.low %v226_v35, %v227_v39  ;;  %v342_v49 = vmul.f32 %v199_v24, %v199_v24 }
  0x28   :  { %v261_v50 = vrot.slane %v253_v42, %v698_v5  ;;  %v343_v51 = vmul.f32 %v201_v31, %v201_v31  ;;  %v352_v52 = vcombine.low %v336_v36, %v337_v37  ;;  %v353_v53 = vcombine.low %v338_v41, %v339_v43 }
  0x29   :  { %v251_v54 = vrot.slane %v237_v46, %v698_v5  ;;  %v268_v55 = vrot.slane %v254_v48, %v698_v5  ;;  %v369_v56 = vcombine.low %v340_v44, %v341_v45  ;;  %v278_v22 = vmul.f32 %v701_v11, %v701_v11 }
  0x2a   :  { %v360_v57 = vrot.slane %v352_v52, %v698_v5  ;;  %v367_v58 = vrot.slane %v353_v53, %v698_v5  ;;  %v370_v59 = vcombine.low %v342_v49, %v343_v51  ;;  %v279_v23 = vmul.f32 %v131_v19, %v131_v19 }
  0x2b   :  { %v252_v60 = vcombine.low %v244_v47, %v251_v54  ;;  %v269_v61 = vcombine.low %v261_v50, %v268_v55  ;;  %v607_v62 = vcombine.low %v251_v54, %v251_v54  ;;  %v608_v63 = vcombine.low %v268_v55, %v268_v55 }
  0x2c   :  { %v368_v0 = vcombine.low %v360_v57, %v367_v58  ;;  %v377_v1 = vrot.slane %v369_v56, %v698_v5  ;;  %v384_v2 = vrot.slane %v370_v59, %v698_v5  ;;  %v611_v3 = vcombine.low %v367_v58, %v367_v58 }
  0x2d   :  { %v406_v4 = vrot.slane %v252_v60, %v698_v5  ;;  %v413_v6 = vrot.slane %v607_v62, %v698_v5  ;;  %v423_v7 = vrot.slane %v269_v61, %v698_v5  ;;  %v430_v8 = vrot.slane %v608_v63, %v698_v5 }
  0x2e   :  { %v385_v9 = vcombine.low %v377_v1, %v384_v2  ;;  %v536_v10 = vrot.slane %v368_v0, %v698_v5  ;;  %v543_v12 = vrot.slane %v611_v3, %v698_v5  ;;  %v612_v17 = vcombine.low %v384_v2, %v384_v2 }
  0x2f   :  { %v414_v14 = vcombine.high %v406_v4, %v406_v4  ;;  %v415_v15 = vcombine.high %v413_v6, %v413_v6  ;;  %v442_v16 = vsel %vm441_vm0, %v406_v4, 0.0  ;;  %v431_v24 = vcombine.high %v423_v7, %v423_v7 }
  0x30   :  { %v432_v25 = vcombine.high %v430_v8, %v430_v8  ;;  %v445_v29 = vsel %vm441_vm0, %v413_v6, 0.0  ;;  %v544_v31 = vcombine.high %v536_v10, %v536_v10  ;;  %v545_v32 = vcombine.high %v543_v12, %v543_v12 }
  0x31   :  { %v443_v28 = vsel %vm441_vm0, %v414_v14, 0.0  ;;  %v553_v33 = vrot.slane %v385_v9, %v698_v5  ;;  %v447_v34 = vsel %vm441_vm0, %v415_v15, 0.0  ;;  %v449_v35 = vsel %vm441_vm0, %v423_v7, 0.0 }
  0x32   :  { %v444_v30 = vadd.f32 %v443_v28, %v442_v16  ;;  %v453_v36 = vsel %vm441_vm0, %v430_v8, 0.0  ;;  %v571_v11 = vsel %vm441_vm0, %v536_v10, 0.0  ;;  %v572_v37 = vsel %vm441_vm0, %v544_v31, 0.0 }
  0x33   :  { %v574_v38 = vsel %vm441_vm0, %v543_v12, 0.0  ;;  %v280_v39 = vmul.f32 %v709_v18, %v709_v18  ;;  %v451_v40 = vsel %vm441_vm0, %v431_v24, 0.0  ;;  %v560_v41 = vrot.slane %v612_v17, %v698_v5 }
  0x34   :  { %v446_v19 = vadd.f32 %v445_v29, %v444_v30  ;;  %v561_v42 = vcombine.high %v553_v33, %v553_v33  ;;  %v573_v43 = vadd.f32 %v572_v37, %v571_v11  ;;  %v576_v45 = vsel %vm441_vm0, %v545_v32, 0.0 }
  0x35   :  { %v281_v46 = vmul.f32 %v724_v26, %v724_v26  ;;  %v282_v47 = vmul.f32 %v704_v13, %v704_v13  ;;  %v578_v49 = vsel %vm441_vm0, %v553_v33, 0.0  ;;  %v283_v18 = vmul.f32 %v718_v21, %v718_v21 }
  0x36   :  { %v448_v44 = vadd.f32 %v447_v34, %v446_v19  ;;  %v575_v48 = vadd.f32 %v574_v38, %v573_v43  ;;  %v284_v50 = vmul.f32 %v714_v20, %v714_v20  ;;  %v285_v52 = vmul.f32 %v728_v27, %v728_v27 }
  0x37   :  { %v294_v53 = vcombine.low %v278_v22, %v279_v23  ;;  %v295_v54 = vcombine.low %v280_v39, %v281_v46  ;;  %v562_v55 = vcombine.high %v560_v41, %v560_v41  ;;  %v580_v56 = vsel %vm441_vm0, %v561_v42, 0.0 }
  0x38   :  { %v450_v51 = vadd.f32 %v449_v35, %v448_v44  ;;  %v577_v26 = vadd.f32 %v576_v45, %v575_v48  ;;  %v311_v13 = vcombine.low %v282_v47, %v283_v18  ;;  %v312_v21 = vcombine.low %v284_v50, %v285_v52 }
  0x39   :  { %v302_v58 = vrot.slane %v294_v53, %v698_v5  ;;  %v309_v59 = vrot.slane %v295_v54, %v698_v5  ;;  %v455_v60 = vsel %vm441_vm0, %v432_v25, 0.0  ;;  %v582_v61 = vsel %vm441_vm0, %v560_v41, 0.0 }
  0x3a   :  { %v452_v57 = vadd.f32 %v451_v40, %v450_v51  ;;  %v579_v20 = vadd.f32 %v578_v49, %v577_v26  ;;  %v319_v27 = vrot.slane %v311_v13, %v698_v5  ;;  %v326_v0 = vrot.slane %v312_v21, %v698_v5 }
  0x3b   :  { %v310_v63 = vcombine.low %v302_v58, %v309_v59  ;;  %v609_v1 = vcombine.low %v309_v59, %v309_v59  ;;  %v584_v3 = vsel %vm441_vm0, %v562_v55, 0.0 }
  0x3c   :  { %v454_v62 = vadd.f32 %v453_v36, %v452_v57  ;;  %v581_v2 = vadd.f32 %v580_v56, %v579_v20  ;;  %v327_v6 = vcombine.low %v319_v27, %v326_v0  ;;  %v610_v10 = vcombine.low %v326_v0, %v326_v0 }
  0x3d   :  { %v472_v7 = vrot.slane %v310_v63, %v698_v5  ;;  %v479_v8 = vrot.slane %v609_v1, %v698_v5 }
  0x3e   :  { %v456_v4 = vadd.f32 %v455_v60, %v454_v62  ;;  %v583_v9 = vadd.f32 %v582_v61, %v581_v2  ;;  %v489_v15 = vrot.slane %v327_v6, %v698_v5  ;;  %v496_v25 = vrot.slane %v610_v10, %v698_v5 }
  0x3f   :  { %v480_v12 = vcombine.high %v472_v7, %v472_v7  ;;  %v481_v14 = vcombine.high %v479_v8, %v479_v8  ;;  %v507_v16 = vsel %vm441_vm0, %v472_v7, 0.0  ;;  %v510_v23 = vsel %vm441_vm0, %v479_v8, 0.0 }
  0x40   :  { %457 = vadd.xlane.f32.xlu0 %v456_v4  ;;  %v585_v17 = vadd.f32 %v584_v3, %v583_v9  ;;  %v497_v28 = vcombine.high %v489_v15, %v489_v15  ;;  %v514_v31 = vsel %vm441_vm0, %v489_v15, 0.0  ;;  %v498_v33 = vcombine.high %v496_v25, %v496_v25 }
  0x41   :  { %v508_v22 = vsel %vm441_vm0, %v480_v12, 0.0  ;;  %v512_v29 = vsel %vm441_vm0, %v481_v14, 0.0  ;;  %v518_v36 = vsel %vm441_vm0, %v496_v25, 0.0 }
  0x42   :  { %586 = vadd.xlane.f32.xlu1 %v585_v17  ;;  %v509_v24 = vadd.f32 %v508_v22, %v507_v16  ;;  %v516_v34 = vsel %vm441_vm0, %v497_v28, 0.0  ;;  %v520_v19 = vsel %vm441_vm0, %v498_v33, 0.0 }
  0x44   :  { %v511_v30 = vadd.f32 %v510_v23, %v509_v24 }
  0x46   :  { %v513_v32 = vadd.f32 %v512_v29, %v511_v30 }
  0x48   :  { %v515_v35 = vadd.f32 %v514_v31, %v513_v32 }
  0x4a   :  { %v517_v11 = vadd.f32 %v516_v34, %v515_v35 }
  0x4c   :  { %v519_v37 = vadd.f32 %v518_v36, %v517_v11 }
  0x4e   :  { %v521_v38 = vadd.f32 %v520_v19, %v519_v37 }
  0x50   :  { %522 = vadd.xlane.f32.xlu0 %v521_v38 }
  0xc9   :  { %v458_v5 = vpop.xlane.xlu0 %457 }
  0xca   :  { %460 = vst.msk [vmem:[%s810_s2] sm:$0x3] %vm459_vm1, %v458_v5 }
  0xcb   :  { %v587_v39 = vpop.xlane.xlu1 %586 }
  0xcc   :  { %588 = vst.msk [vmem:[%s812_s4] sm:$0x3] %vm459_vm1, %v587_v39 }
  0xd9   :  { %v523_v40 = vpop.xlane.xlu0 %522 }
  0xda   :  { %524 = vst.msk [vmem:[%s811_s3] sm:$0x3] %vm459_vm1, %v523_v40 }
  0xdb   :  { %601 = vsyncpa [#allocation6], 1 }
  0xdc   :  { %602 = vsyncpa [#allocation8], 1 }

</bundles_post_ra>
